<compile_context>
chip_gen: v5e
topology: v5e:2x2
jax: 0.10.0
libtpu: 0.0.40
codegen_flags: <defaults>
</compile_context>

<pallas_src>
import functools
import math

import jax
import jax.numpy as jnp
from jax import lax
from jax.experimental import pallas as pl
from jax.experimental.pallas import tpu as pltpu


# dot_general dimension_numbers for `x @ W.T`: contract dim 1 of x with dim 1
# of W (W is (out, in)). Avoids any in-kernel transpose.
_DN_XT = (((1,), (1,)), ((), ()))


def _processing_attention_kernel(tok_ref, res_ref, wq_ref, wk_ref, wv_ref,
                                 out_ref, k_scr, v_scr, *, n_heads: int):
    """One grid step = (batch element b, query tile s).

    tok_ref : (1, TS, D) token_embeddings tile (queries)
    res_ref : (1, L, D)  residual_state tile   (keys / values, full length)
    wq/wk/wv: (D, D)     projection weights, PyTorch (out, in) layout;
                         wq already carries the 1/sqrt(d_k) scale.
    out_ref : (1, TS, D) attention output tile
    k_scr/v_scr : (L, D) VMEM scratch holding K/V projections for batch b.
    """
    s_idx = pl.program_id(1)
    compute_dtype = tok_ref.dtype  # native dtype feeds the MXU (no f32 upcast)

    # K/V projections do not depend on the query tile: compute them once per
    # batch element (first S step) into VMEM scratch and reuse for all tiles.
    @pl.when(s_idx == 0)
    def _():
        res = res_ref[0]                                             # (L, D)
        k = lax.dot_general(res, wk_ref[...], _DN_XT,
                            preferred_element_type=jnp.float32)      # (L, D)
        v = lax.dot_general(res, wv_ref[...], _DN_XT,
                            preferred_element_type=jnp.float32)      # (L, D)
        k_scr[...] = k.astype(k_scr.dtype)
        v_scr[...] = v.astype(v_scr.dtype)

    tok = tok_ref[0]                                                 # (TS, D)
    # Q projection (scale pre-folded into Wq); accumulate in f32, then cast
    # back to the compute dtype so the score matmul stays on the fast path.
    q = lax.dot_general(tok, wq_ref[...], _DN_XT,
                        preferred_element_type=jnp.float32
                        ).astype(compute_dtype)                      # (TS, D)

    d_model = out_ref.shape[-1]
    d_k = d_model // n_heads

    # Static per-head loop; heads are static column slices. Each head writes
    # straight into its out_ref slice (no concatenate, no lingering buffers).
    for h in range(n_heads):
        lo = h * d_k
        qh = q[:, lo:lo + d_k]                                       # (TS, d_k)
        kh = k_scr[:, lo:lo + d_k]                                   # (L,  d_k)
        vh = v_scr[:, lo:lo + d_k]                                   # (L,  d_k)

        # scores = qh @ kh.T (scale already folded into Wq), f32 accumulate.
        s = lax.dot_general(qh, kh, _DN_XT,
                            preferred_element_type=jnp.float32)      # (TS, L)

        # Numerically-stable softmax over keys, kept in f32 (v5e-safe).
        # Exact divide (the approx reciprocal caused the reference mismatch).
        m = jnp.max(s, axis=-1, keepdims=True)
        p = jnp.exp(s - m)
        denom = jnp.sum(p, axis=-1, keepdims=True)
        w = p / denom

        # Dropout on attention weights: identity in eval/inference mode.
        # Downcast probs to the value dtype so the PV matmul uses the fast
        # MXU path; accumulation is still f32.
        head_out = jnp.dot(w.astype(vh.dtype), vh,
                           preferred_element_type=jnp.float32)       # (TS, d_k)
        out_ref[0, :, lo:lo + d_k] = head_out.astype(out_ref.dtype)


def processing_attention(token_embeddings, residual_state, wq, wk, wv,
                         *, n_heads: int):
    B, S, D = token_embeddings.shape
    Bk, L, Dk = residual_state.shape
    assert B == Bk and D == Dk and D % n_heads == 0
    d_k = D // n_heads

    # Fold the 1/sqrt(d_k) score scale into the query weight once on host.
    wq_scaled = (wq.astype(jnp.float32) * (1.0 / math.sqrt(d_k))).astype(
        wq.dtype)

    # Query-tile size along S: full S when small, otherwise a clean 128/256/512
    # tile (keeps blocks (8,128)-legal and gives the pipeline/megacore depth).
    ts = S
    for cand in (512, 256, 128):
        if S > cand and S % cand == 0:
            ts = cand
            break
    grid = (B, S // ts)

    itemsize = jnp.dtype(token_embeddings.dtype).itemsize
    # Double-buffered tok/res/out tiles + (double-buffered) resident weights
    # + K/V scratch + f32 intermediates, with generous headroom.
    # (Weights keep a constant index_map so they are never re-fetched; a
    #  pipeline_mode=pl.Buffered(1) on their specs would additionally halve
    #  their buffer footprint if VMEM ever becomes the constraint.)
    est = (2 * (ts * D + L * D + ts * D) * itemsize
           + 2 * 3 * D * D * itemsize
           + 2 * L * D * itemsize
           + (ts * D + ts * L + ts * d_k) * 4 * 4)
    vmem_limit = int(min(max(4 * est, 8 * 2**20), 100 * 2**20))

    kernel = functools.partial(_processing_attention_kernel, n_heads=n_heads)

    return pl.pallas_call(
        kernel,
        out_shape=jax.ShapeDtypeStruct((B, S, D), token_embeddings.dtype),
        grid_spec=pltpu.PrefetchScalarGridSpec(
            num_scalar_prefetch=0,
            grid=grid,
            in_specs=[
                pl.BlockSpec((1, ts, D), lambda b, s: (b, s, 0)),  # tokens (Q)
                pl.BlockSpec((1, L, D), lambda b, s: (b, 0, 0)),   # residual (K/V)
                pl.BlockSpec((D, D), lambda b, s: (0, 0)),         # Wq (pre-scaled)
                pl.BlockSpec((D, D), lambda b, s: (0, 0)),         # Wk
                pl.BlockSpec((D, D), lambda b, s: (0, 0)),         # Wv
            ],
            out_specs=pl.BlockSpec((1, ts, D), lambda b, s: (b, s, 0)),
            scratch_shapes=[
                pltpu.VMEM((L, D), residual_state.dtype),          # K scratch
                pltpu.VMEM((L, D), residual_state.dtype),          # V scratch
            ],
        ),
        compiler_params=pltpu.CompilerParams(
            dimension_semantics=("parallel", "arbitrary"),
            vmem_limit_bytes=vmem_limit),
    )(token_embeddings, residual_state, wq_scaled, wk, wv)


def _reference(token_embeddings, residual_state, wq, wk, wv, *, n_heads: int):
    """Pure-JAX (f32) reference mirroring the PyTorch forward in eval mode."""
    B, S, D = token_embeddings.shape
    _, L, _ = residual_state.shape
    d_k = D // n_heads
    q = token_embeddings @ wq.T
    k = residual_state @ wk.T
    v = residual_state @ wv.T
    q = q.reshape(B, S, n_heads, d_k).transpose(0, 2, 1, 3)
    k = k.reshape(B, L, n_heads, d_k).transpose(0, 2, 1, 3)
    v = v.reshape(B, L, n_heads, d_k).transpose(0, 2, 1, 3)
    scores = jnp.einsum("bhsd,bhld->bhsl", q, k) / math.sqrt(d_k)
    w = jax.nn.softmax(scores, axis=-1)
    attn = jnp.einsum("bhsl,bhld->bhsd", w, v)
    return attn.transpose(0, 2, 1, 3).reshape(B, S, D)


if __name__ == "__main__":
    # Small shapes consistent with the module's forward signature.
    B = 2          # batch_size
    S = 16         # seq_len (token_embeddings -> queries, output rows)
    L = 8          # fixed_kv_length (residual_state -> keys/values)
    D = 32         # d_model
    H = 4          # n_heads (d_k = 8)

    key = jax.random.PRNGKey(0)
    k_tok, k_res, k_wq, k_wk, k_wv = jax.random.split(key, 5)

    token_embeddings = jax.random.normal(k_tok, (B, S, D), dtype=jnp.float32)
    residual_state = jax.random.normal(k_res, (B, L, D), dtype=jnp.float32)

    # Deterministic parameter init (PyTorch Linear-style uniform bound).
    bound = 1.0 / math.sqrt(D)
    wq = jax.random.uniform(k_wq, (D, D), jnp.float32, -bound, bound)
    wk = jax.random.uniform(k_wk, (D, D), jnp.float32, -bound, bound)
    wv = jax.random.uniform(k_wv, (D, D), jnp.float32, -bound, bound)

    ref = _reference(token_embeddings, residual_state, wq, wk, wv, n_heads=H)

    # f32 path: exact-arithmetic check against the reference.
    out = processing_attention(token_embeddings, residual_state, wq, wk, wv,
                               n_heads=H)
    out = jax.block_until_ready(out)
    assert out.shape == (B, S, D)
    assert jnp.allclose(out, ref, atol=1e-4, rtol=1e-4), "mismatch vs reference"

    # bf16 path: exercises the native-dtype MXU feeding (no f32 upcast inside
    # the kernel); loose tolerance accounts for bf16 rounding only.
    out_bf16 = processing_attention(
        token_embeddings.astype(jnp.bfloat16),
        residual_state.astype(jnp.bfloat16),
        wq.astype(jnp.bfloat16), wk.astype(jnp.bfloat16),
        wv.astype(jnp.bfloat16), n_heads=H)
    out_bf16 = jax.block_until_ready(out_bf16)
    assert out_bf16.shape == (B, S, D)
    assert bool(jnp.all(jnp.isfinite(out_bf16.astype(jnp.float32))))
    assert jnp.allclose(out_bf16.astype(jnp.float32), ref,
                        atol=1e-1, rtol=1e-1), "bf16 path mismatch"

    print("KERNEL_OK")
</pallas_src>

<mosaic_0001>
module attributes {stable_mosaic.version = 11 : i64} {
  func.func @_processing_attention_kernel(%arg0: i32, %arg1: i32, %arg2: memref<1x16x32xf32, #tpu.memory_space<vmem>>, %arg3: memref<1x8x32xf32, #tpu.memory_space<vmem>>, %arg4: memref<32x32xf32, #tpu.memory_space<vmem>>, %arg5: memref<32x32xf32, #tpu.memory_space<vmem>>, %arg6: memref<32x32xf32, #tpu.memory_space<vmem>>, %arg7: memref<1x16x32xf32, #tpu.memory_space<vmem>>, %arg8: memref<8x32xf32, #tpu.memory_space<vmem>>, %arg9: memref<8x32xf32, #tpu.memory_space<vmem>>) attributes {dimension_semantics = [#tpu.dimension_semantics<parallel>, #tpu.dimension_semantics<arbitrary>], iteration_bounds = array<i64: 2, 1>, scalar_prefetch = 0 : i64, scratch_operands = 2 : i64, tpu.core_type = #tpu.core_type<tc>, window_params = [{transform_indices = @transform_0, window_bounds = array<i64: 1, 16, 32>}, {transform_indices = @transform_1, window_bounds = array<i64: 1, 8, 32>}, {pipeline_mode = #tpu.pipeline_mode<synchronous>, transform_indices = @transform_2, window_bounds = array<i64: 32, 32>}, {pipeline_mode = #tpu.pipeline_mode<synchronous>, transform_indices = @transform_3, window_bounds = array<i64: 32, 32>}, {pipeline_mode = #tpu.pipeline_mode<synchronous>, transform_indices = @transform_4, window_bounds = array<i64: 32, 32>}, {transform_indices = @transform_5, window_bounds = array<i64: 1, 16, 32>}]} {
    %c0_i32 = arith.constant 0 : i32
    %0 = arith.cmpi eq, %arg1, %c0_i32 : i32
    %1 = arith.extui %0 : i1 to i32
    %c0_i32_0 = arith.constant 0 : i32
    %2 = arith.cmpi ne, %1, %c0_i32_0 : i32
    scf.if %2 {
      %c0_46 = arith.constant 0 : index
      %c0_47 = arith.constant 0 : index
      %c0_48 = arith.constant 0 : index
      %75 = vector.load %arg3[%c0_46, %c0_47, %c0_48] : memref<1x8x32xf32, #tpu.memory_space<vmem>>, vector<1x8x32xf32>
      %76 = vector.shape_cast %75 : vector<1x8x32xf32> to vector<8x32xf32>
      %c0_49 = arith.constant 0 : index
      %c0_50 = arith.constant 0 : index
      %77 = vector.load %arg5[%c0_49, %c0_50] : memref<32x32xf32, #tpu.memory_space<vmem>>, vector<32x32xf32>
      %cst_51 = arith.constant dense<0.000000e+00> : vector<8x32xf32>
      %78 = tpu.matmul %76, %77, %cst_51 {dimension_numbers = #tpu.dot_dimension_numbers<[1], [1], [0], [0], [0, 0, 1, 0], [], []>} : vector<8x32xf32>, vector<32x32xf32>, vector<8x32xf32> -> vector<8x32xf32>
      %c0_52 = arith.constant 0 : index
      %c0_53 = arith.constant 0 : index
      %79 = vector.load %arg6[%c0_52, %c0_53] : memref<32x32xf32, #tpu.memory_space<vmem>>, vector<32x32xf32>
      %cst_54 = arith.constant dense<0.000000e+00> : vector<8x32xf32>
      %80 = tpu.matmul %76, %79, %cst_54 {dimension_numbers = #tpu.dot_dimension_numbers<[1], [1], [0], [0], [0, 0, 1, 0], [], []>} : vector<8x32xf32>, vector<32x32xf32>, vector<8x32xf32> -> vector<8x32xf32>
      %c0_55 = arith.constant 0 : index
      %c0_56 = arith.constant 0 : index
      %81 = vector.load %arg8[%c0_55, %c0_56] : memref<8x32xf32, #tpu.memory_space<vmem>>, vector<8x32xf32>
      tpu.vector_store %arg8[%c0_55, %c0_56], %78 {strides = array<i32>} : memref<8x32xf32, #tpu.memory_space<vmem>>, vector<8x32xf32>,
      %c0_57 = arith.constant 0 : index
      %c0_58 = arith.constant 0 : index
      %82 = vector.load %arg9[%c0_57, %c0_58] : memref<8x32xf32, #tpu.memory_space<vmem>>, vector<8x32xf32>
      tpu.vector_store %arg9[%c0_57, %c0_58], %80 {strides = array<i32>} : memref<8x32xf32, #tpu.memory_space<vmem>>, vector<8x32xf32>,
    } else {
    }
    %c0 = arith.constant 0 : index
    %c0_1 = arith.constant 0 : index
    %c0_2 = arith.constant 0 : index
    %3 = vector.load %arg2[%c0, %c0_1, %c0_2] : memref<1x16x32xf32, #tpu.memory_space<vmem>>, vector<1x16x32xf32>
    %4 = vector.shape_cast %3 : vector<1x16x32xf32> to vector<16x32xf32>
    %c0_3 = arith.constant 0 : index
    %c0_4 = arith.constant 0 : index
    %5 = vector.load %arg4[%c0_3, %c0_4] : memref<32x32xf32, #tpu.memory_space<vmem>>, vector<32x32xf32>
    %cst = arith.constant dense<0.000000e+00> : vector<16x32xf32>
    %6 = tpu.matmul %4, %5, %cst {dimension_numbers = #tpu.dot_dimension_numbers<[1], [1], [0], [0], [0, 0, 1, 0], [], []>} : vector<16x32xf32>, vector<32x32xf32>, vector<16x32xf32> -> vector<16x32xf32>
    %7 = vector.extract_strided_slice %6 {offsets = [0, 0], sizes = [16, 8], strides = [1, 1]} : vector<16x32xf32> to vector<16x8xf32>
    %c0_5 = arith.constant 0 : index
    %c0_6 = arith.constant 0 : index
    %8 = vector.load %arg8[%c0_5, %c0_6] : memref<8x32xf32, #tpu.memory_space<vmem>>, vector<8x8xf32>
    %c0_7 = arith.constant 0 : index
    %c0_8 = arith.constant 0 : index
    %9 = vector.load %arg9[%c0_7, %c0_8] : memref<8x32xf32, #tpu.memory_space<vmem>>, vector<8x8xf32>
    %cst_9 = arith.constant dense<0.000000e+00> : vector<16x8xf32>
    %10 = tpu.matmul %7, %8, %cst_9 {dimension_numbers = #tpu.dot_dimension_numbers<[1], [1], [0], [0], [0, 0, 1, 0], [], []>} : vector<16x8xf32>, vector<8x8xf32>, vector<16x8xf32> -> vector<16x8xf32>
    %cst_10 = arith.constant dense<0xFF800000> : vector<16xf32>
    %11 = vector.multi_reduction <maximumf>, %10, %cst_10 [1] : vector<16x8xf32> to vector<16xf32>
    %12 = vector.shape_cast %11 : vector<16xf32> to vector<16x1xf32>
    %13 = vector.broadcast %12 : vector<16x1xf32> to vector<16x8xf32>
    %14 = arith.subf %10, %13 : vector<16x8xf32>
    %15 = math.exp %14 : vector<16x8xf32>
    %cst_11 = arith.constant dense<0.000000e+00> : vector<16xf32>
    %16 = vector.multi_reduction <add>, %15, %cst_11 [1] : vector<16x8xf32> to vector<16xf32>
    %17 = vector.shape_cast %16 : vector<16xf32> to vector<16x1xf32>
    %18 = vector.broadcast %17 : vector<16x1xf32> to vector<16x8xf32>
    %19 = arith.divf %15, %18 : vector<16x8xf32>
    %cst_12 = arith.constant dense<0.000000e+00> : vector<16x8xf32>
    %20 = tpu.matmul %19, %9, %cst_12 {dimension_numbers = #tpu.dot_dimension_numbers<[1], [0], [0], [1], [0, 0, 1, 1], [], []>} : vector<16x8xf32>, vector<8x8xf32>, vector<16x8xf32> -> vector<16x8xf32>
    %c0_13 = arith.constant 0 : index
    %c0_14 = arith.constant 0 : index
    %c0_15 = arith.constant 0 : index
    %21 = vector.load %arg7[%c0_13, %c0_14, %c0_15] : memref<1x16x32xf32, #tpu.memory_space<vmem>>, vector<1x16x8xf32>
    %22 = vector.shape_cast %21 : vector<1x16x8xf32> to vector<16x8xf32>
    %23 = vector.shape_cast %20 : vector<16x8xf32> to vector<1x16x8xf32>
    tpu.vector_store %arg7[%c0_13, %c0_14, %c0_15], %23 {strides = array<i32>} : memref<1x16x32xf32, #tpu.memory_space<vmem>>, vector<1x16x8xf32>,
    %24 = vector.extract_strided_slice %6 {offsets = [0, 8], sizes = [16, 8], strides = [1, 1]} : vector<16x32xf32> to vector<16x8xf32>
    %c0_16 = arith.constant 0 : index
    %c8 = arith.constant 8 : index
    %25 = vector.load %arg8[%c0_16, %c8] : memref<8x32xf32, #tpu.memory_space<vmem>>, vector<8x8xf32>
    %c0_17 = arith.constant 0 : index
    %c8_18 = arith.constant 8 : index
    %26 = vector.load %arg9[%c0_17, %c8_18] : memref<8x32xf32, #tpu.memory_space<vmem>>, vector<8x8xf32>
    %cst_19 = arith.constant dense<0.000000e+00> : vector<16x8xf32>
    %27 = tpu.matmul %24, %25, %cst_19 {dimension_numbers = #tpu.dot_dimension_numbers<[1], [1], [0], [0], [0, 0, 1, 0], [], []>} : vector<16x8xf32>, vector<8x8xf32>, vector<16x8xf32> -> vector<16x8xf32>
    %cst_20 = arith.constant dense<0xFF800000> : vector<16xf32>
    %28 = vector.multi_reduction <maximumf>, %27, %cst_20 [1] : vector<16x8xf32> to vector<16xf32>
    %29 = vector.shape_cast %28 : vector<16xf32> to vector<16x1xf32>
    %30 = vector.broadcast %29 : vector<16x1xf32> to vector<16x8xf32>
    %31 = arith.subf %27, %30 : vector<16x8xf32>
    %32 = math.exp %31 : vector<16x8xf32>
    %cst_21 = arith.constant dense<0.000000e+00> : vector<16xf32>
    %33 = vector.multi_reduction <add>, %32, %cst_21 [1] : vector<16x8xf32> to vector<16xf32>
    %34 = vector.shape_cast %33 : vector<16xf32> to vector<16x1xf32>
    %35 = vector.broadcast %34 : vector<16x1xf32> to vector<16x8xf32>
    %36 = arith.divf %32, %35 : vector<16x8xf32>
    %cst_22 = arith.constant dense<0.000000e+00> : vector<16x8xf32>
    %37 = tpu.matmul %36, %26, %cst_22 {dimension_numbers = #tpu.dot_dimension_numbers<[1], [0], [0], [1], [0, 0, 1, 1], [], []>} : vector<16x8xf32>, vector<8x8xf32>, vector<16x8xf32> -> vector<16x8xf32>
    %c0_23 = arith.constant 0 : index
    %c0_24 = arith.constant 0 : index
    %c8_25 = arith.constant 8 : index
    %38 = vector.load %arg7[%c0_23, %c0_24, %c8_25] : memref<1x16x32xf32, #tpu.memory_space<vmem>>, vector<1x16x8xf32>
    %39 = vector.shape_cast %38 : vector<1x16x8xf32> to vector<16x8xf32>
    %40 = vector.shape_cast %37 : vector<16x8xf32> to vector<1x16x8xf32>
    tpu.vector_store %arg7[%c0_23, %c0_24, %c8_25], %40 {strides = array<i32>} : memref<1x16x32xf32, #tpu.memory_space<vmem>>, vector<1x16x8xf32>,
    %41 = vector.extract_strided_slice %6 {offsets = [0, 16], sizes = [16, 8], strides = [1, 1]} : vector<16x32xf32> to vector<16x8xf32>
    %c0_26 = arith.constant 0 : index
    %c16 = arith.constant 16 : index
    %42 = vector.load %arg8[%c0_26, %c16] : memref<8x32xf32, #tpu.memory_space<vmem>>, vector<8x8xf32>
    %c0_27 = arith.constant 0 : index
    %c16_28 = arith.constant 16 : index
    %43 = vector.load %arg9[%c0_27, %c16_28] : memref<8x32xf32, #tpu.memory_space<vmem>>, vector<8x8xf32>
    %cst_29 = arith.constant dense<0.000000e+00> : vector<16x8xf32>
    %44 = tpu.matmul %41, %42, %cst_29 {dimension_numbers = #tpu.dot_dimension_numbers<[1], [1], [0], [0], [0, 0, 1, 0], [], []>} : vector<16x8xf32>, vector<8x8xf32>, vector<16x8xf32> -> vector<16x8xf32>
    %cst_30 = arith.constant dense<0xFF800000> : vector<16xf32>
    %45 = vector.multi_reduction <maximumf>, %44, %cst_30 [1] : vector<16x8xf32> to vector<16xf32>
    %46 = vector.shape_cast %45 : vector<16xf32> to vector<16x1xf32>
    %47 = vector.broadcast %46 : vector<16x1xf32> to vector<16x8xf32>
    %48 = arith.subf %44, %47 : vector<16x8xf32>
    %49 = math.exp %48 : vector<16x8xf32>
    %cst_31 = arith.constant dense<0.000000e+00> : vector<16xf32>
    %50 = vector.multi_reduction <add>, %49, %cst_31 [1] : vector<16x8xf32> to vector<16xf32>
    %51 = vector.shape_cast %50 : vector<16xf32> to vector<16x1xf32>
    %52 = vector.broadcast %51 : vector<16x1xf32> to vector<16x8xf32>
    %53 = arith.divf %49, %52 : vector<16x8xf32>
    %cst_32 = arith.constant dense<0.000000e+00> : vector<16x8xf32>
    %54 = tpu.matmul %53, %43, %cst_32 {dimension_numbers = #tpu.dot_dimension_numbers<[1], [0], [0], [1], [0, 0, 1, 1], [], []>} : vector<16x8xf32>, vector<8x8xf32>, vector<16x8xf32> -> vector<16x8xf32>
    %c0_33 = arith.constant 0 : index
    %c0_34 = arith.constant 0 : index
    %c16_35 = arith.constant 16 : index
    %55 = vector.load %arg7[%c0_33, %c0_34, %c16_35] : memref<1x16x32xf32, #tpu.memory_space<vmem>>, vector<1x16x8xf32>
    %56 = vector.shape_cast %55 : vector<1x16x8xf32> to vector<16x8xf32>
    %57 = vector.shape_cast %54 : vector<16x8xf32> to vector<1x16x8xf32>
    tpu.vector_store %arg7[%c0_33, %c0_34, %c16_35], %57 {strides = array<i32>} : memref<1x16x32xf32, #tpu.memory_space<vmem>>, vector<1x16x8xf32>,
    %58 = vector.extract_strided_slice %6 {offsets = [0, 24], sizes = [16, 8], strides = [1, 1]} : vector<16x32xf32> to vector<16x8xf32>
    %c0_36 = arith.constant 0 : index
    %c24 = arith.constant 24 : index
    %59 = vector.load %arg8[%c0_36, %c24] : memref<8x32xf32, #tpu.memory_space<vmem>>, vector<8x8xf32>
    %c0_37 = arith.constant 0 : index
    %c24_38 = arith.constant 24 : index
    %60 = vector.load %arg9[%c0_37, %c24_38] : memref<8x32xf32, #tpu.memory_space<vmem>>, vector<8x8xf32>
    %cst_39 = arith.constant dense<0.000000e+00> : vector<16x8xf32>
    %61 = tpu.matmul %58, %59, %cst_39 {dimension_numbers = #tpu.dot_dimension_numbers<[1], [1], [0], [0], [0, 0, 1, 0], [], []>} : vector<16x8xf32>, vector<8x8xf32>, vector<16x8xf32> -> vector<16x8xf32>
    %cst_40 = arith.constant dense<0xFF800000> : vector<16xf32>
    %62 = vector.multi_reduction <maximumf>, %61, %cst_40 [1] : vector<16x8xf32> to vector<16xf32>
    %63 = vector.shape_cast %62 : vector<16xf32> to vector<16x1xf32>
    %64 = vector.broadcast %63 : vector<16x1xf32> to vector<16x8xf32>
    %65 = arith.subf %61, %64 : vector<16x8xf32>
    %66 = math.exp %65 : vector<16x8xf32>
    %cst_41 = arith.constant dense<0.000000e+00> : vector<16xf32>
    %67 = vector.multi_reduction <add>, %66, %cst_41 [1] : vector<16x8xf32> to vector<16xf32>
    %68 = vector.shape_cast %67 : vector<16xf32> to vector<16x1xf32>
    %69 = vector.broadcast %68 : vector<16x1xf32> to vector<16x8xf32>
    %70 = arith.divf %66, %69 : vector<16x8xf32>
    %cst_42 = arith.constant dense<0.000000e+00> : vector<16x8xf32>
    %71 = tpu.matmul %70, %60, %cst_42 {dimension_numbers = #tpu.dot_dimension_numbers<[1], [0], [0], [1], [0, 0, 1, 1], [], []>} : vector<16x8xf32>, vector<8x8xf32>, vector<16x8xf32> -> vector<16x8xf32>
    %c0_43 = arith.constant 0 : index
    %c0_44 = arith.constant 0 : index
    %c24_45 = arith.constant 24 : index
    %72 = vector.load %arg7[%c0_43, %c0_44, %c24_45] : memref<1x16x32xf32, #tpu.memory_space<vmem>>, vector<1x16x8xf32>
    %73 = vector.shape_cast %72 : vector<1x16x8xf32> to vector<16x8xf32>
    %74 = vector.shape_cast %71 : vector<16x8xf32> to vector<1x16x8xf32>
    tpu.vector_store %arg7[%c0_43, %c0_44, %c24_45], %74 {strides = array<i32>} : memref<1x16x32xf32, #tpu.memory_space<vmem>>, vector<1x16x8xf32>,
    return
  }
  func.func @transform_0(%arg0: i32, %arg1: i32) -> (i32, i32, i32) {
    %c0_i32 = arith.constant 0 : i32
    %c0_i32_0 = arith.constant 0 : i32
    return %arg0, %arg1, %c0_i32 : i32, i32, i32
  }
  func.func @transform_1(%arg0: i32, %arg1: i32) -> (i32, i32, i32) {
    %c0_i32 = arith.constant 0 : i32
    %c0_i32_0 = arith.constant 0 : i32
    %c0_i32_1 = arith.constant 0 : i32
    return %arg0, %c0_i32, %c0_i32_0 : i32, i32, i32
  }
  func.func @transform_2(%arg0: i32, %arg1: i32) -> (i32, i32) {
    %c0_i32 = arith.constant 0 : i32
    %c0_i32_0 = arith.constant 0 : i32
    %c0_i32_1 = arith.constant 0 : i32
    return %c0_i32, %c0_i32_0 : i32, i32
  }
  func.func @transform_3(%arg0: i32, %arg1: i32) -> (i32, i32) {
    %c0_i32 = arith.constant 0 : i32
    %c0_i32_0 = arith.constant 0 : i32
    %c0_i32_1 = arith.constant 0 : i32
    return %c0_i32, %c0_i32_0 : i32, i32
  }
  func.func @transform_4(%arg0: i32, %arg1: i32) -> (i32, i32) {
    %c0_i32 = arith.constant 0 : i32
    %c0_i32_0 = arith.constant 0 : i32
    %c0_i32_1 = arith.constant 0 : i32
    return %c0_i32, %c0_i32_0 : i32, i32
  }
  func.func @transform_5(%arg0: i32, %arg1: i32) -> (i32, i32, i32) {
    %c0_i32 = arith.constant 0 : i32
    %c0_i32_0 = arith.constant 0 : i32
    return %arg0, %arg1, %c0_i32 : i32, i32, i32
  }
}

</mosaic_0001>

<bundles_post_ra>
// kernel: tpu_custom_call.1
= control target key start
LH: loop header
LB: loop body
LE: loop exit
PB: predicated region body
PF: predicated region fallthrough
CT: control target
= control target key end

     0   :  { %s1996_s0 = inlined_call_operand.hbm [shape: f32[2,16,32], index: 0, kind: input, shape index: {}]   ;;  %s1997_s1 = inlined_call_operand.hbm [shape: f32[2,8,32], index: 1, kind: input, shape index: {}]   ;;  %s1998_s2 = inlined_call_operand.hbm [shape: f32[32,32], index: 2, kind: input, shape index: {}]   ;;  %s1999_s3 = inlined_call_operand.hbm [shape: f32[32,32], index: 3, kind: input, shape index: {}]   ;;  %s2000_s4 = inlined_call_operand.hbm [shape: f32[32,32], index: 4, kind: input, shape index: {}]   ;;  %s2001_s5 = inlined_call_operand.hbm [shape: f32[2,16,32], index: 5, kind: output, shape index: {}]  }
   0x1   :  { %2006 = sst [smem:[#allocation22_spill]] %s1998_s2 }
   0x2   :  { %2007 = sst [smem:[#allocation23_spill]] %s1999_s3 }
   0x3   :  { %2008 = sst [smem:[#allocation24_spill]] %s2000_s4 }
   0x4   :  { %10 = vsyncpa [#allocation5], 0 }
   0x5   :  { %12 = vsyncpa [#allocation5 + $0x1], 0 }
   0x6   :  { %13 = vsyncpa [#allocation8], 0 }
   0x7   :  { %15 = vsyncpa [#allocation8 + $0x1], 0 }
   0x8   :  { %16 = vsyncpa [#allocation11], 0 }
   0x9   :  { %17 = vsyncpa [#allocation6], 0 }
   0xa   :  { %19 = vsyncpa [#allocation6 + $0x1], 0  ;;  %s1633_s18 = smov 0   ;;  %s1635_s19 = smov 0  }
   0xb   :  { %s1637_s20 = smov 0   ;;  %s1639_s21 = smov 0  }
   0xc   :  { %s1641_s22 = smov 0   ;;  %s1643_s23 = smov 0  }
   0xd LB: > { %2009 = sst [smem:[#allocation19_spill]] %s1577_s20  ;;  %s1664_s24 = sadd.s32 4294967295, %s1589_s23   ;;  %s1589_s23 = sphi %s1643_s23, %s25_s23   ;;  %s1585_s22 = sphi %s1641_s22, %s2033_s22   ;;  %s1581_s21 = sphi %s1639_s21, %s2032_s21   ;;  %s1577_s20 = sphi %s1637_s20, %s2028_s20   ;;  %s1573_s19 = sphi %s1635_s19, %s2031_s19   ;;  %s1569_s18 = sphi %s1633_s18, %s2030_s18  }
   0xe   : > { %s1145_s25 = sadd.s32 4294967294, %s1589_s23   ;;  %p59_p0 = scmp.ne.s32.totalorder %s1573_s19, %s1569_s18 }
   0xf   : > { %p60_p1 = scmp.eq.s32.totalorder %s1664_s24, 0  ;;  %p174_p2 = scmp.eq.s32.totalorder %s1664_s24, 1 }
  0x10   : > { %p180_p3 = scmp.eq.s32.totalorder %s1145_s25, 1  ;;  %p1146_p5 = scmp.ge.s32.totalorder %s1589_s23, 1 }
  0x11   : > { %p1673_p4 = por %p60_p1, %p59_p0  ;;  %p187_p7 = scmp.lt.s32.totalorder %s1589_s23, 3 }
  0x12   : > { %p1678_p6 = por %p180_p3, %p59_p0  ;;  %s2012_s2 = sld [smem:[#allocation22_spill]] }
  0x13   : > { %p1686_p8 = pnand %p1146_p5, %p187_p7  ;;  %s1591_s7 = smov [#allocation9]  }
  0x14   : > { %s200_s8 = sshll.u32 %s1591_s7, 4  ;;  %p1150_p11 = scmp.ge.s32.totalorder %s1589_s23, 2  ;;  %s201_s8 = int_to_ptr.vmem [resolvable:$true] %s200_s8 }
  0x15   : > { %p1224_p9 = pneg %p1686_p8  ;;  %s2015_s3 = sld [smem:[#allocation23_spill]] }
  0x16   : > { %s2002_s13 = smov 128   ;;  %s2003_s14 = smov 8  }
  0x17   : > { %p1694_p10 = pnand %p1224_p9, %p60_p1  ;;  %s1594_s15 = smov [#allocation10]  }
  0x18   : > { %s198_s30 = sshll.u32 %s2012_s2, 4  ;;  %s214_s16 = sshll.u32 %s1594_s15, 4  ;;  %s199_s30 = int_to_ptr.hbm [resolvable:$true] %s198_s30  ;;  %s215_s16 = int_to_ptr.vmem [resolvable:$true] %s214_s16 }
  0x19   : > { %1227 = dma.hbm_to_vmem [thread:$0]  (!%p1694_p10), %s199_s30, 512, %s201_s8, [#allocation8], %s2002_s13, %s2002_s13, %s2003_s14  }
  0x1a   : > { %s2016_s4 = sld [smem:[#allocation24_spill]]  ;;  %s1595_s29 = smov [#allocation12]  }
  0x1b   : > { %s212_s12 = sshll.u32 %s2015_s3, 4  ;;  %s228_s7 = sshll.u32 %s1595_s29, 4  ;;  %s213_s12 = int_to_ptr.hbm [resolvable:$true] %s212_s12  ;;  %s229_s7 = int_to_ptr.vmem [resolvable:$true] %s228_s7 }
  0x1c   : > { %1230 = dma.hbm_to_vmem [thread:$0]  (!%p1694_p10), %s213_s12, 512, %s215_s16, [#allocation11], %s2002_s13, %s2002_s13, %s2003_s14  }
  0x1d   : > { %s37_s30 = sadd.s32 1, %s1585_s22  ;;  %s46_s8 = sadd.s32 1, %s1577_s20 }
  0x1e   : > { %p39_p12 = scmp.ge.s32.totalorder %s37_s30, 2  ;;  %p53_p13 = scmp.ne.s32.totalorder %s1577_s20, %s1573_s19 }
  0x1f   : > { %p54_p0 = scmp.eq.s32.totalorder %s1589_s23, 0  ;;  %p1248_p7 = scmp.lt.s32.totalorder %s1589_s23, 2 }
  0x20   : > { %s226_s28 = sshll.u32 %s2016_s4, 4  ;;  %s2035_s30 = smov (%p39_p12, %s37_s30), 0  ;;  %s227_s28 = int_to_ptr.hbm [resolvable:$true] %s226_s28 }
  0x21   : > { %1233 = dma.hbm_to_vmem [thread:$0]  (!%p1694_p10), %s227_s28, 512, %s229_s7, [#allocation11], %s2002_s13, %s2002_s13, %s2003_s14  }
  0x22   : > { %2017 = sst [smem:[#allocation20_spill]] %s2035_s30  ;;  %p1727_p3 = por %p54_p0, %p53_p13 }
  0x23   : > { %p1733_p5 = por %p174_p2, %p53_p13  ;;  %s41_s11 = ssub.s32 %s1585_s22, %s2035_s30 }
  0x24   : > { %p44_p9 = scmp.eq.s32.totalorder %s41_s11, 0  ;;  %s242_s12 = sand.u32 1, %s1577_s20  }
  0x25   : > { %s1151_s15 = sshll.u32 %s242_s12, 4  ;;  %s1204_s17 = sshll.u32 %s1585_s22, 4 }
  0x26   : > { %s1742_s16 = scalar_select %p44_p9, %s1577_s20, %s46_s8  }
  0x27   : > { %s253_s29 = scalar_lea.hbm %s1996_s0, %s1204_s17  ;;  %s246_s7 = scalar_lea.vmem [#allocation4], %s1151_s15 }
  0x28   : > { %2020 = sst [smem:[#allocation21_spill]] %s1742_s16  ;;  %s256_s13 = sshll.u32 %s246_s7, 4  ;;  %s257_s13 = int_to_ptr.vmem [resolvable:$true] %s256_s13 }
  0x29   : > { %s254_s14 = sshll.u32 %s253_s29, 4  ;;  %p1235_p2 = pnand %p1248_p7, %p1727_p3  ;;  %s255_s14 = int_to_ptr.hbm [resolvable:$true] %s254_s14 }
  0x2a   : > { %s266_s2 = sand.u32 1, %s1589_s23   ;;  %s1154_s3 = sshll.u32 %s242_s12, 3 }
  0x2b   : > { %s243_s11 = scalar_lea.sflag [#allocation5], %s242_s12  ;;  %s2021_s4 = smov 8  }
  0x2c   : > { %s2022_s30 = smov 128   ;;  %s1155_s8 = sshll.u32 %s1585_s22, 3 }
  0x2d   : > { %1237 = dma.hbm_to_vmem [thread:$0]  (!%p1235_p2), %s255_s14, 256, %s257_s13, %s243_s11, %s2022_s30, %s2022_s30, %s2021_s4  }
  0x2e   : > { %s274_s25 = scalar_lea.hbm %s1997_s1, %s1155_s8  ;;  %s270_s17 = scalar_lea.vmem [#allocation7], %s1154_s3 }
  0x2f   : > { %s278_s15 = sshll.u32 %s270_s17, 4  ;;  %s276_s28 = sshll.u32 %s274_s25, 4  ;;  %s279_s15 = int_to_ptr.vmem [resolvable:$true] %s278_s15  ;;  %s277_s28 = int_to_ptr.hbm [resolvable:$true] %s276_s28 }
  0x30   : > { %s267_s29 = scalar_lea.sflag [#allocation8], %s266_s2  ;;  %287 = sbr.rel (%p1686_p8) target bundleno = 1006 (0x3ee), region = 40 }
  0x31   : > { %1240 = dma.hbm_to_vmem [thread:$0]  (!%p1235_p2), %s277_s28, 128, %s279_s15, %s267_s29  }
  0x32   : > { %s1761_s10 = sand.u32 (!%p1686_p8), 1, %s1573_s19  }
  0x33   : > { %s1157_s4 = sshll.u32 (!%p1686_p8), %s1761_s10, 4  ;;  %s290_s20 = scalar_lea.sflag (!%p1686_p8), [#allocation5], %s1761_s10 }
  0x34   : > { %s1767_s3 = scalar_lea.vmem (!%p1686_p8), [#allocation4], %s1157_s4 }
  0x35   : > { %1548 = dma.done.wait (%p1673_p4), %s290_s20, 256  }
  0x36   : > { %1550 = vsyncadd (%p1673_p4), %s290_s20, 4294967040  ;;  %s299_s2 = sand.u32 1, %s1664_s24   ;;  %s1158_s6 = sshll.u32 %s1761_s10, 3 }
  0x37   : > { %s300_s13 = scalar_lea.sflag [#allocation8], %s299_s2  ;;  %s303_s14 = scalar_lea.vmem [#allocation7], %s1158_s6 }
  0x38   : > { %1552 = dma.done.wait (%p1673_p4), %s300_s13, 128  }
  0x39   : > { %1554 = vsyncadd (%p1673_p4), %s300_s13, 4294967168 }
  0x3a   : > { %1556 = dma.done.wait (%p60_p1), [#allocation8], 512  }
  0x3b   : > { %1558 = vsyncadd (%p60_p1), [#allocation8], 4294966784 }
  0x3c   : > { %1560 = dma.done.wait (%p60_p1), [#allocation11], 1024  }
  0x3d   : > { %1562 = vsyncadd (%p60_p1), [#allocation11], 4294966272  ;;  %vm362_vm0 = vcmask 261120   ;;  %v361_v0 = vld [vmem:[#allocation10 + $0x18] sm:$0xff]  ;;  %v360_v2 = vld [vmem:[#allocation10 + $0x10] sm:$0xff]  ;;  %vm486_vm1 = vcmask 64512  }
  0x3e   : > { %v441_v1 = vld [vmem:[#allocation9 + $0x18] sm:$0xff]  ;;  %1163 = vmatpush.xpose.msk.msra.mxu0 %vm362_vm0, %v361_v0  ;;  %v440_v3 = vld [vmem:[#allocation9 + $0x10] sm:$0xff]  ;;  %v359_v4 = vld [vmem:[#allocation10 + $0x8] sm:$0xff]  ;;  %s1596_s24 = smov 112   ;;  %s1597_s26 = smov 120  }
  0x3f   : > { %1173 = vmatpush.xpose.msk.msra.mxu2 %vm362_vm0, %v441_v1  ;;  %v439_v5 = vld [vmem:[#allocation9 + $0x8] sm:$0xff]  ;;  %v358_v6 = vld [vmem:[#allocation10] sm:$0xff]  ;;  %v357_v8 = vld [vmem:[%s303_s14] sm:$0xff]  ;;  %s1598_s30 = smov 104   ;;  %s1938_s12 = scalar_lea.vmem [#allocation13], %s1157_s4 }
  0x40   : > { %v438_v7 = vld [vmem:[#allocation9] sm:$0xff]  ;;  %v437_v10 = vld [vmem:[%s1767_s3 + $0x8] sm:$0xff]  ;;  %v400_v29 = vld [vmem:[#allocation12 + $0x10] sm:$0xff]  ;;  %s1599_s16 = smov 8   ;;  %s1600_s7 = smov 24  }
  0x41   : > { %v436_v9 = vld [vmem:[%s1767_s3] sm:$0xff]  ;;  %v401_v28 = vld [vmem:[#allocation12 + $0x18] sm:$0xff]  ;;  %v399_v30 = vld [vmem:[#allocation12 + $0x8] sm:$0xff]  ;;  %s1601_s11 = smov 16   ;;  %s1205_s8 = sshll.u32 %s1581_s21, 4 }
  0x42   : > { %1164 = vmatpush.xpose.msk.msra.mxu0 %vm362_vm0, %v360_v2  ;;  %1168 = vmatpush.xpose.msk.msra.mxu1 %vm362_vm0, %v401_v28  ;;  %v398_v31 = vld [vmem:[#allocation12] sm:$0xff]  ;;  %s1002_s15 = scalar_lea.hbm %s2001_s5, %s1205_s8  ;;  %s1003_s28 = sshll.u32 %s1938_s12, 4  ;;  %s1004_s28 = int_to_ptr.vmem [resolvable:$true] %s1003_s28 }
  0x43   : > { %1174 = vmatpush.xpose.msk.msra.mxu2 %vm362_vm0, %v440_v3  ;;  %s1005_s29 = sshll.u32 %s1002_s15, 4  ;;  %s989_s4 = scalar_lea.sflag [#allocation6], %s1761_s10  ;;  %s1006_s29 = int_to_ptr.hbm [resolvable:$true] %s1005_s29 }
  0x44   : > { %s1509_s20 = sshra.s32 %s1006_s29, 4  ;;  %s1515_s6 = scalar_lea.hbm %s2001_s5, 32  ;;  %s1510_s20 = int_to_ptr.hbm [resolvable:$true] %s1509_s20 }
  0x45   : > { %s1511_s21 = scalar_lea.hbm %s1510_s20, 16  ;;  %p1516_p10 = scmp.lt.s32.totalorder %s1510_s20, %s2001_s5 }
  0x46   : > { %1165 = vmatpush.xpose.msk.msra.mxu0 %vm362_vm0, %v359_v4  ;;  %1169 = vmatpush.xpose.msk.msra.mxu1 %vm362_vm0, %v400_v29  ;;  %p1512_p1 = scmp.ne.s32.totalorder %s1510_s20, %s1511_s21  ;;  %p1517_p12 = scmp.lt.s32.totalorder %s1515_s6, %s1511_s21 }
  0x47   : > { %1175 = vmatpush.xpose.msk.msra.mxu2 %vm362_vm0, %v439_v5 }
  0x48   : > { %p1513_p4 = pnand %p1512_p1, %p1733_p5  ;;  %p1518_p13 = por %p1517_p12, %p1516_p10 }
  0x4a   : > { %1166 = vmatpush.xpose.msk.msra.mxu0 %vm362_vm0, %v358_v6  ;;  %1170 = vmatpush.xpose.msk.msra.mxu1 %vm362_vm0, %v399_v30  ;;  %p1514_p8 = pneg %p1513_p4 }
  0x4b   : > { %1176 = vmatpush.xpose.msk.msra.mxu2 %vm362_vm0, %v438_v7 }
  0x4c   : > { %p1519_p0 = pnand %p1518_p13, %p1514_p8 }
  0x4d   : > { %1167 = vmatmul.msk.f32.vlgmr.msra.gmra.mxu0 %vm362_vm0, %v357_v8 }
  0x4e   : > { %1177 = vmatmul.msk.f32.vlgmr.msra.gmra.mxu2 %vm362_vm0, %v436_v9  ;;  %1171 = vmatpush.xpose.msk.msra.mxu1 %vm362_vm0, %v398_v31 }
  0x51   : > { %1172 = vmatmul.msk.f32.vlgmr.msra.gmra.mxu1 %vm362_vm0, %v357_v8 }
  0x56   : > { %1178 = vmatmul.msk.f32.gmra.mxu2 %vm362_vm0, %v437_v10 }
  0xca   : > { %v395_v11 = vpop.f32.mrf.mxu0 }
  0xcb   : > { %434 = vst.msk [vmem:[#allocation2] sm:$0xff] %vm362_vm0, %v395_v11 }
  0xce   : > { %v431_v57 = vpop.f32.mrf.mxu1 }
  0xcf   : > { %435 = vst.msk [vmem:[#allocation3] sm:$0xff] %vm362_vm0, %v431_v57 }
  0xd1   : > { %v478_v12 = vpop.f32.mrf.mxu2 }
  0xd2   : > { %v728_v13 = vld [vmem:[#allocation2] sm:$0xff] }
  0xd3   : > { %735 = vrot.lane.b32.xlu1 %v728_v13, %s1596_s24  ;;  %605 = vrot.lane.b32.xlu0 %v728_v13, %s1597_s26 }
  0xd4   : > { %1179 = vmatpush.xpose.msk.msra.mxu3 %vm486_vm1, %v728_v13 }
  0xd6   : > { %v1846_v1 = vld [vmem:[#allocation3] sm:$0xff] }
  0xd7   : > { %1180 = vmatmul.msk.f32.vlgmr.msra.gmra.mxu3 %vm486_vm1, %v478_v12 }
  0xd8   : > { %588 = vmatpush.msrb.mxu3 %v1846_v1 }
  0xd9   : > { %v481_v14 = vpop.f32.mrf.mxu2 }
  0xda   : > { %602 = vrot.lane.b32.xlu2 %v481_v14, %s1597_s26 }
  0xdb   : > { %730 = vrot.lane.b32.xlu1 %v478_v12, %s1596_s24  ;;  %600 = vrot.lane.b32.xlu0 %v478_v12, %s1597_s26 }
  0xdf   : > { %1181 = vmatmul.msk.f32.gmra.mxu3 %vm486_vm1, %v481_v14 }
  0xe2   : > { %732 = vrot.lane.b32.xlu2 %v481_v14, %s1596_s24 }
  0xe3   : > { %860 = vrot.lane.b32.xlu1 %v478_v12, %s1598_s30  ;;  %865 = vrot.lane.b32.xlu0 %v728_v13, %s1598_s30 }
  0xea   : > { %862 = vrot.lane.b32.xlu2 %v481_v14, %s1598_s30 }
 0x134   : > { %v603_v17 = vpop.permute.xlu2 %602 }
 0x13c   : > { %v733_v20 = vpop.permute.xlu2 %732 }
 0x144   : > { %v863_v27 = vpop.permute.xlu2 %862 }
 0x145   : > { %v736_v15 = vpop.permute.xlu1 %735  ;;  %v606_v16 = vpop.permute.xlu0 %605 }
 0x146   : > { %1184 = vmatpush.xpose.msk.msrb.mxu0 %vm486_vm1, %v606_v16  ;;  %1189 = vmatpush.xpose.msk.msrb.mxu2 %vm486_vm1, %v736_v15 }
 0x14d   : > { %v731_v18 = vpop.permute.xlu1 %730  ;;  %v601_v19 = vpop.permute.xlu0 %600 }
 0x14e   : > { %1185 = vmatmul.msk.f32.vlgmr.msrb.gmra.mxu0 %vm486_vm1, %v601_v19  ;;  %1190 = vmatmul.msk.f32.vlgmr.msrb.gmra.mxu2 %vm486_vm1, %v731_v18 }
 0x155   : > { %v866_v21 = vpop.permute.xlu0 %865  ;;  %v861_v24 = vpop.permute.xlu1 %860 }
 0x156   : > { %1186 = vmatmul.msk.f32.gmra.mxu0 %vm486_vm1, %v603_v17  ;;  %1191 = vmatmul.msk.f32.gmra.mxu2 %vm486_vm1, %v733_v20 }
 0x157   : > { %1194 = vmatpush.xpose.msk.msra.mxu0 %vm486_vm1, %v866_v21 }
 0x15a   : > { %v513_v22 = vpop.f32.mrf.mxu3 }
 0x15b   : > { %v519_v23 = vsel %vm486_vm1, %v513_v22, -inf }
 0x15c   : > { %520 = vmax.xlane.f32.xlu0 %v519_v23 }
 0x15e   : > { %1195 = vmatmul.msk.f32.vlgmr.msra.gmra.mxu0 %vm486_vm1, %v861_v24 }
 0x162   : > { %v516_v25 = vpop.f32.mrf.mxu3 }
 0x163   : > { %v522_v26 = vsel %vm486_vm1, %v516_v25, -inf }
 0x164   : > { %523 = vmax.xlane.f32.xlu2 %v522_v26 }
 0x166   : > { %1196 = vmatmul.msk.f32.gmra.mxu0 %vm486_vm1, %v863_v27 }
 0x1cb   : > { %v630_v32 = vpop.f32.mrf.mxu0 }
 0x1cc   : > { %v636_v33 = vsel %vm486_vm1, %v630_v32, -inf }
 0x1cd   : > { %637 = vmax.xlane.f32.xlu1 %v636_v33 }
 0x1cf   : > { %v521_v34 = vpop.xlane.xlu0 %520 }
 0x1d0   : > { %v525_v37 = vsub.f32 %v513_v22, %v521_v34 }
 0x1d1   : > { %v760_v35 = vpop.f32.mrf.mxu2 }
 0x1d2   : > { %v766_v36 = vsel %vm486_vm1, %v760_v35, -inf  ;;  %v527_v40 = vmul.f32 1.442695, %v525_v37 }
 0x1d3   : > { %v633_v38 = vpop.f32.mrf.mxu0  ;;  %767 = vmax.xlane.f32.xlu0 %v766_v36 }
 0x1d4   : > { %v639_v39 = vsel %vm486_vm1, %v633_v38, -inf  ;;  %1313 = vpow2.f32 %v527_v40 }
 0x1d5   : > { %640 = vmax.xlane.f32.xlu2 %v639_v39 }
 0x1d7   : > { %v524_v41 = vpop.xlane.xlu2 %523 }
 0x1d8   : > { %v526_v43 = vsub.f32 %v516_v25, %v524_v41 }
 0x1d9   : > { %v763_v42 = vpop.f32.mrf.mxu2 }
 0x1da   : > { %v769_v46 = vsel %vm486_vm1, %v763_v42, -inf  ;;  %v529_v47 = vmul.f32 1.442695, %v526_v43  ;;  %v1834_v48 = vpop.eup %1313 }
 0x1db   : > { %v890_v44 = vpop.f32.mrf.mxu0  ;;  %v531_v51 = vsel %vm486_vm1, %v1834_v48, 0.0 }
 0x1dc   : > { %v896_v45 = vsel %vm486_vm1, %v890_v44, -inf  ;;  %1315 = vpow2.f32 %v529_v47 }
 0x1dd   : > { %897 = vmax.xlane.f32.xlu1 %v896_v45  ;;  %770 = vmax.xlane.f32.xlu2 %v769_v46 }
 0x1e2   : > { %v1839_v52 = vpop.eup %1315 }
 0x1e3   : > { %v893_v49 = vpop.f32.mrf.mxu0  ;;  %v534_v53 = vsel %vm486_vm1, %v1839_v52, 0.0 }
 0x1e4   : > { %v899_v50 = vsel %vm486_vm1, %v893_v49, -inf }
 0x1e5   : > { %900 = vmax.xlane.f32.xlu0 %v899_v50  ;;  %532 = vadd.xlane.f32.xlu1 %v531_v51 }
 0x1ed   : > { %535 = vadd.xlane.f32.xlu0 %v534_v53 }
 0x240   : > { %v638_v54 = vpop.xlane.xlu1 %637 }
 0x241   : > { %v642_v55 = vsub.f32 %v630_v32, %v638_v54 }
 0x243   : > { %v644_v56 = vmul.f32 1.442695, %v642_v55 }
 0x245   : > { %1317 = vpow2.f32 %v644_v56 }
 0x246   : > { %v768_v58 = vpop.xlane.xlu0 %767 }
 0x247   : > { %v772_v59 = vsub.f32 %v760_v35, %v768_v58 }
 0x248   : > { %v641_v60 = vpop.xlane.xlu2 %640 }
 0x249   : > { %v774_v61 = vmul.f32 1.442695, %v772_v59  ;;  %v643_v62 = vsub.f32 %v633_v38, %v641_v60 }
 0x24b   : > { %v1844_v63 = vpop.eup %1317  ;;  %1319 = vpow2.f32 %v774_v61  ;;  %v646_v0 = vmul.f32 1.442695, %v643_v62 }
 0x24c   : > { %v648_v2 = vsel %vm486_vm1, %v1844_v63, 0.0 }
 0x24d   : > { %1321 = vpow2.f32 %v646_v0  ;;  %649 = vadd.xlane.f32.xlu2 %v648_v2 }
 0x250   : > { %v898_v3 = vpop.xlane.xlu1 %897  ;;  %v771_v4 = vpop.xlane.xlu2 %770 }
 0x251   : > { %v1851_v5 = vpop.eup %1319  ;;  %v902_v6 = vsub.f32 %v890_v44, %v898_v3  ;;  %v773_v7 = vsub.f32 %v763_v42, %v771_v4 }
 0x252   : > { %v778_v11 = vsel %vm486_vm1, %v1851_v5, 0.0 }
 0x253   : > { %v1853_v8 = vpop.eup %1321  ;;  %v904_v9 = vmul.f32 1.442695, %v902_v6  ;;  %v776_v10 = vmul.f32 1.442695, %v773_v7 }
 0x254   : > { %v651_v12 = vsel %vm486_vm1, %v1853_v8, 0.0 }
 0x255   : > { %1323 = vpow2.f32 %v904_v9  ;;  %779 = vadd.xlane.f32.xlu2 %v778_v11  ;;  %652 = vadd.xlane.f32.xlu1 %v651_v12 }
 0x256   : > { %1325 = vpow2.f32 %v776_v10 }
 0x258   : > { %v533_v13 = vpop.xlane.xlu1 %532  ;;  %v901_v14 = vpop.xlane.xlu0 %900 }
 0x259   : > { %1327 = vrcp.f32 %v533_v13  ;;  %v903_v15 = vsub.f32 %v893_v49, %v901_v14  ;;  %v548_v25 = vand.u32 2147483648, %v533_v13  ;;  %v546_v28 = vand.u32 2147483647, %v533_v13 }
 0x25a   : > { %vm542_vm3 = vweird.f32 %v533_v13 }
 0x25b   : > { %v1859_v16 = vpop.eup %1323  ;;  %v906_v18 = vmul.f32 1.442695, %v903_v15  ;;  %v549_v32 = vor.u32 1.1754944e-38, %v548_v25  ;;  %vm547_vm5 = vcmp.eq.f32.partialorder %v546_v28, 8.507059e+37 }
 0x25c   : > { %v1861_v17 = vpop.eup %1325  ;;  %v908_v19 = vsel %vm486_vm1, %v1859_v16, 0.0 }
 0x25d   : > { %909 = vadd.xlane.f32.xlu0 %v908_v19  ;;  %v781_v20 = vsel %vm486_vm1, %v1861_v17, 0.0  ;;  %1329 = vpow2.f32 %v906_v18 }
 0x25e   : > { %782 = vadd.xlane.f32.xlu1 %v781_v20 }
 0x25f   : > { %v1328_v21 = vpop.eup %1327 }
 0x260   : > { %v538_v22 = vmul.f32 %v1328_v21, %v533_v13  ;;  %v536_v23 = vpop.xlane.xlu0 %535  ;;  %vm543_vm2 = vweird.f32 %v1328_v21 }
 0x261   : > { %1331 = vrcp.f32 %v536_v23  ;;  %vm544_vm4 = vmor %vm542_vm3, %vm543_vm2  ;;  %v563_v38 = vand.u32 2147483648, %v536_v23  ;;  %v561_v40 = vand.u32 2147483647, %v536_v23  ;;  %vm557_vm7 = vweird.f32 %v536_v23 }
 0x262   : > { %v539_v24 = vsub.f32 1.0, %v538_v22 }
 0x263   : > { %v1867_v26 = vpop.eup %1329  ;;  %v564_v42 = vor.u32 1.1754944e-38, %v563_v38  ;;  %vm562_vm9 = vcmp.eq.f32.partialorder %v561_v40, 8.507059e+37 }
 0x264   : > { %v540_v27 = vmul.f32 %v1328_v21, %v539_v24  ;;  %v911_v29 = vsel %vm486_vm1, %v1867_v26, 0.0 }
 0x265   : > { %912 = vadd.xlane.f32.xlu0 %v911_v29 }
 0x266   : > { %v541_v30 = vadd.f32 %v1328_v21, %v540_v27 }
 0x267   : > { %v1332_v31 = vpop.eup %1331 }
 0x268   : > { %v553_v33 = vmul.f32 %v1332_v31, %v536_v23  ;;  %v545_v34 = vsel %vm544_vm4, %v1328_v21, %v541_v30  ;;  %vm558_vm6 = vweird.f32 %v1332_v31 }
 0x269   : > { %v550_v35 = vsel %vm547_vm5, %v549_v32, %v545_v34  ;;  %vm559_vm8 = vmor %vm557_vm7, %vm558_vm6 }
 0x26a   : > { %v554_v36 = vsub.f32 1.0, %v553_v33  ;;  %v551_v37 = vmul.f32 %v1834_v48, %v550_v35 }
 0x26c   : > { %v555_v39 = vmul.f32 %v1332_v31, %v554_v36  ;;  %1182 = vmatmul.msk.f32.vlgmr.msrb.gmra.mxu3 %vm486_vm1, %v551_v37 }
 0x26d   : > { %685 = vrot.lane.b32.xlu2 %v1846_v1, %s1597_s26 }
 0x26e   : > { %v556_v41 = vadd.f32 %v1332_v31, %v555_v39 }
 0x270   : > { %v560_v43 = vsel %vm559_vm8, %v1332_v31, %v556_v41 }
 0x271   : > { %v565_v44 = vsel %vm562_vm9, %v564_v42, %v560_v43 }
 0x272   : > { %v566_v45 = vmul.f32 %v1839_v52, %v565_v44 }
 0x274   : > { %1183 = vmatmul.msk.f32.gmra.mxu3 %vm486_vm1, %v566_v45 }
 0x277   : > { %815 = vrot.lane.b32.xlu1 %v1846_v1, %s1596_s24 }
 0x279   : > { %945 = vrot.lane.b32.xlu0 %v1846_v1, %s1598_s30 }
 0x2c0   : > { %v650_v46 = vpop.xlane.xlu2 %649 }
 0x2c1   : > { %1333 = vrcp.f32 %v650_v46  ;;  %v665_v53 = vand.u32 2147483648, %v650_v46  ;;  %vm659_vm11 = vweird.f32 %v650_v46  ;;  %v663_v55 = vand.u32 2147483647, %v650_v46 }
 0x2c3   : > { %v666_v0 = vor.u32 1.1754944e-38, %v665_v53  ;;  %vm664_vm13 = vcmp.eq.f32.partialorder %v663_v55, 8.507059e+37 }
 0x2c7   : > { %v1334_v47 = vpop.eup %1333 }
 0x2c8   : > { %v655_v48 = vmul.f32 %v1334_v47, %v650_v46  ;;  %v653_v49 = vpop.xlane.xlu1 %652  ;;  %v1881_v50 = vpop.xlane.xlu2 %779  ;;  %vm660_vm10 = vweird.f32 %v1334_v47 }
 0x2c9   : > { %1335 = vrcp.f32 %v653_v49  ;;  %vm1884_vm12 = vmor %vm659_vm11, %vm660_vm10  ;;  %v680_v3 = vand.u32 2147483648, %v653_v49  ;;  %v678_v10 = vand.u32 2147483647, %v653_v49  ;;  %vm674_vm15 = vweird.f32 %v653_v49 }
 0x2ca   : > { %v656_v51 = vsub.f32 1.0, %v655_v48  ;;  %1337 = vrcp.f32 %v1881_v50  ;;  %v795_v30 = vand.u32 2147483648, %v1881_v50  ;;  %vm789_vm4 = vweird.f32 %v1881_v50 }
 0x2cb   : > { %v681_v13 = vor.u32 1.1754944e-38, %v680_v3  ;;  %vm679_vm2 = vcmp.eq.f32.partialorder %v678_v10, 8.507059e+37  ;;  %v793_v31 = vand.u32 2147483647, %v1881_v50 }
 0x2cc   : > { %v657_v52 = vmul.f32 %v1334_v47, %v656_v51  ;;  %v796_v37 = vor.u32 1.1754944e-38, %v795_v30 }
 0x2cd   : > { %vm794_vm8 = vcmp.eq.f32.partialorder %v793_v31, 8.507059e+37 }
 0x2ce   : > { %v658_v54 = vadd.f32 %v1334_v47, %v657_v52 }
 0x2cf   : > { %v1336_v56 = vpop.eup %1335 }
 0x2d0   : > { %v1338_v58 = vpop.eup %1337  ;;  %v670_v59 = vmul.f32 %v1336_v56, %v653_v49  ;;  %v1888_v60 = vpop.xlane.xlu0 %909  ;;  %v662_v62 = vsel %vm1884_vm12, %v1334_v47, %v658_v54  ;;  %vm675_vm14 = vweird.f32 %v1336_v56 }
 0x2d1   : > { %v686_v61 = vpop.permute.xlu2 %685  ;;  %1339 = vrcp.f32 %v1888_v60  ;;  %v1893_v1 = vpop.xlane.xlu1 %782  ;;  %v785_v4 = vmul.f32 %v1338_v58, %v1881_v50  ;;  %v667_v6 = vsel %vm664_vm13, %v666_v0, %v662_v62  ;;  %vm676_vm0 = vmor %vm674_vm15, %vm675_vm14  ;;  %vm790_vm3 = vweird.f32 %v1338_v58 }
 0x2d2   : > { %709 = vmatpush.msrb.mxu1 %v686_v61  ;;  %v671_v2 = vsub.f32 1.0, %v670_v59  ;;  %1341 = vrcp.f32 %v1893_v1  ;;  %v668_v9 = vmul.f32 %v1844_v63, %v667_v6  ;;  %vm791_vm5 = vmor %vm789_vm4, %vm790_vm3  ;;  %vm919_vm7 = vweird.f32 %v1888_v60 }
 0x2d3   : > { %v786_v14 = vsub.f32 1.0, %v785_v4  ;;  %v923_v38 = vand.u32 2147483647, %v1888_v60  ;;  %v810_v44 = vand.u32 2147483648, %v1893_v1  ;;  %vm804_vm12 = vweird.f32 %v1893_v1 }
 0x2d4   : > { %v672_v7 = vmul.f32 %v1336_v56, %v671_v2  ;;  %1187 = vmatmul.msk.f32.vlgmr.msrb.gmra.mxu1 %vm486_vm1, %v668_v9  ;;  %v808_v48 = vand.u32 2147483647, %v1893_v1  ;;  %vm855_vm4 = vcmask 195712  }
 0x2d5   : > { %v787_v22 = vmul.f32 %v1338_v58, %v786_v14  ;;  %vm924_vm11 = vcmp.eq.f32.partialorder %v923_v38, 8.507059e+37  ;;  %v811_v53 = vor.u32 1.1754944e-38, %v810_v44 }
 0x2d6   : > { %v673_v11 = vadd.f32 %v1336_v56, %v672_v7 }
 0x2d7   : > { %v1340_v12 = vpop.eup %1339  ;;  %v788_v27 = vadd.f32 %v1338_v58, %v787_v22 }
 0x2d8   : > { %v1899_v15 = vpop.eup %1341  ;;  %v915_v18 = vmul.f32 %v1340_v12, %v1888_v60  ;;  %v677_v19 = vsel %vm676_vm0, %v1336_v56, %v673_v11  ;;  %v1902_v20 = vpop.xlane.xlu0 %912  ;;  %vm920_vm6 = vweird.f32 %v1340_v12  ;;  %vm809_vm0 = vcmp.eq.f32.partialorder %v808_v48, 8.507059e+37 }
 0x2d9   : > { %v682_v21 = vsel %vm679_vm2, %v681_v13, %v677_v19  ;;  %1343 = vrcp.f32 %v1902_v20  ;;  %v800_v23 = vmul.f32 %v1899_v15, %v1893_v1  ;;  %v792_v34 = vsel %vm791_vm5, %v1338_v58, %v788_v27  ;;  %vm921_vm9 = vmor %vm919_vm7, %vm920_vm6 }
 0x2da   : > { %v916_v63 = vsub.f32 1.0, %v915_v18  ;;  %v683_v24 = vmul.f32 %v1853_v8, %v682_v21  ;;  %v925_v8 = vand.u32 2147483648, %v1888_v60  ;;  %v797_v39 = vsel %vm794_vm8, %v796_v37, %v792_v34 }
 0x2db   : > { %v801_v28 = vsub.f32 1.0, %v800_v23  ;;  %vm805_vm10 = vweird.f32 %v1899_v15  ;;  %v798_v47 = vmul.f32 %v1851_v5, %v797_v39  ;;  %v940_v51 = vand.u32 2147483648, %v1902_v20 }
 0x2dc   : > { %v917_v25 = vmul.f32 %v1340_v12, %v916_v63  ;;  %1188 = vmatmul.msk.f32.gmra.mxu1 %vm486_vm1, %v683_v24  ;;  %v926_v42 = vor.u32 1.1754944e-38, %v925_v8  ;;  %vm1923_vm13 = vmor %vm804_vm12, %vm805_vm10  ;;  %vm934_vm15 = vweird.f32 %v1902_v20  ;;  %v938_v55 = vand.u32 2147483647, %v1902_v20 }
 0x2dd   : > { %v802_v35 = vmul.f32 %v1899_v15, %v801_v28  ;;  %v941_v58 = vor.u32 1.1754944e-38, %v940_v51  ;;  %vm985_vm5 = vcmask 261312  }
 0x2de   : > { %v918_v33 = vadd.f32 %v1340_v12, %v917_v25  ;;  %vm939_vm3 = vcmp.eq.f32.partialorder %v938_v55, 8.507059e+37 }
 0x2df   : > { %v1344_v29 = vpop.eup %1343  ;;  %v803_v43 = vadd.f32 %v1899_v15, %v802_v35 }
 0x2e0   : > { %v930_v32 = vmul.f32 %v1344_v29, %v1902_v20  ;;  %v922_v40 = vsel %vm921_vm9, %v1340_v12, %v918_v33  ;;  %vm935_vm14 = vweird.f32 %v1344_v29 }
 0x2e1   : > { %v927_v45 = vsel %vm924_vm11, %v926_v42, %v922_v40  ;;  %v807_v52 = vsel %vm1923_vm13, %v1899_v15, %v803_v43  ;;  %vm936_vm2 = vmor %vm934_vm15, %vm935_vm14 }
 0x2e2   : > { %v931_v36 = vsub.f32 1.0, %v930_v32  ;;  %v928_v54 = vmul.f32 %v1859_v16, %v927_v45  ;;  %v812_v56 = vsel %vm809_vm0, %v811_v53, %v807_v52 }
 0x2e3   : > { %v813_v16 = vmul.f32 %v1861_v17, %v812_v56 }
 0x2e4   : > { %v932_v41 = vmul.f32 %v1344_v29, %v931_v36 }
 0x2e6   : > { %v933_v50 = vadd.f32 %v1344_v29, %v932_v41 }
 0x2e8   : > { %v937_v57 = vsel %vm936_vm2, %v1344_v29, %v933_v50 }
 0x2e9   : > { %v816_v46 = vpop.permute.xlu1 %815  ;;  %v942_v60 = vsel %vm939_vm3, %v941_v58, %v937_v57 }
 0x2ea   : > { %839 = vmatpush.msra.mxu3 %v816_v46  ;;  %v943_v61 = vmul.f32 %v1867_v26, %v942_v60 }
 0x2eb   : > { %1192 = vmatmul.msk.f32.vlgmr.msra.gmra.mxu3 %vm486_vm1, %v798_v47  ;;  %v946_v5 = vpop.permute.xlu0 %945 }
 0x2ec   : > { %969 = vmatpush.msra.mxu1 %v946_v5 }
 0x2ed   : > { %1197 = vmatmul.msk.f32.vlgmr.msra.gmra.mxu1 %vm486_vm1, %v928_v54 }
 0x2ef   : > { %v590_v59 = vpop.f32.mrf.mxu3 }
 0x2f0   : > { %596 = vst.msk [vmem:[%s1938_s12] sm:$0xff] %vm486_vm1, %v590_v59 }
 0x2f3   : > { %1193 = vmatmul.msk.f32.gmra.mxu3 %vm486_vm1, %v813_v16 }
 0x2f5   : > { %1198 = vmatmul.msk.f32.gmra.mxu1 %vm486_vm1, %v943_v61 }
 0x2f7   : > { %v593_v62 = vpop.f32.mrf.mxu3 }
 0x2f8   : > { %597 = vst.msk [vmem:[%s1938_s12 + $0x8] sm:$0xff] %vm486_vm1, %v593_v62  ;;  %vm725_vm1 = vcmask 130112  }
 0x351   : > { %v711_v0 = vpop.f32.mrf.mxu1 }
 0x352   : > { %719 = vrot.lane.b32.xlu2 %v711_v0, %s1599_s16 }
 0x359   : > { %v714_v1 = vpop.f32.mrf.mxu1 }
 0x35a   : > { %721 = vrot.lane.b32.xlu1 %v714_v1, %s1599_s16 }
 0x36a   : > { %v971_v17 = vpop.f32.mrf.mxu1 }
 0x36b   : > { %979 = vrot.lane.b32.xlu1 %v971_v17, %s1600_s7 }
 0x36e   : > { %v841_v26 = vpop.f32.mrf.mxu3 }
 0x36f   : > { %849 = vrot.lane.b32.xlu0 %v841_v26, %s1601_s11 }
 0x372   : > { %v974_v2 = vpop.f32.mrf.mxu1 }
 0x376   : > { %v844_v3 = vpop.f32.mrf.mxu3 }
 0x377   : > { %851 = vrot.lane.b32.xlu2 %v844_v3, %s1601_s11  ;;  %981 = vrot.lane.b32.xlu0 %v974_v2, %s1600_s7 }
 0x3ac   : > { %v720_v4 = vpop.permute.xlu2 %719 }
 0x3ad   : > { %726 = vst.msk [vmem:[%s1938_s12] sm:$0xff] %vm725_vm1, %v720_v4 }
 0x3cc   : > { %v722_v6 = vpop.permute.xlu1 %721 }
 0x3cd   : > { %727 = vst.msk [vmem:[%s1938_s12 + $0x8] sm:$0xff] %vm725_vm1, %v722_v6 }
 0x3d1   : > { %v852_v7 = vpop.permute.xlu2 %851 }
 0x3d2   : > { %857 = vst.msk [vmem:[%s1938_s12 + $0x8] sm:$0xff] %vm855_vm4, %v852_v7 }
 0x3dd   : > { %v980_v10 = vpop.permute.xlu1 %979 }
 0x3e1   : > { %v850_v9 = vpop.permute.xlu0 %849 }
 0x3e2   : > { %856 = vst.msk [vmem:[%s1938_s12] sm:$0xff] %vm855_vm4, %v850_v9 }
 0x3e3   : > { %986 = vst.msk [vmem:[%s1938_s12] sm:$0xff] %vm985_vm5, %v980_v10 }
 0x3e9   : > { %v982_v11 = vpop.permute.xlu0 %981 }
 0x3ea   : > { %987 = vst.msk [vmem:[%s1938_s12 + $0x8] sm:$0xff] %vm985_vm5, %v982_v11 }
 0x3eb   : > { %1522 = shalt.err (!%p1519_p0)
}
 0x3ec   : > { %s1602_s10 = smov 128  }
 0x3ed   : > { %1222 = dma.vmem_to_hbm [thread:$0]  (%p1733_p5), %s1004_s28, 256, %s1006_s29, %s989_s4, %s1602_s10, %s1602_s10, %s1599_s16  }
 0x3ee PF: > { %s1020_s24 = sand.u32 1, %s1569_s18   ;;  %p1242_p3 = pnand %p1150_p11, %p1678_p6 }
 0x3ef   : > { %s1021_s26 = scalar_lea.sflag [#allocation6], %s1020_s24 }
 0x3f0   : > { %p1243_p7 = pneg %p1242_p3 }
 0x3f2   : > { %1564 = dma.done.wait (%p1243_p7), %s1021_s26, 256  }
 0x3f3   : > { %1566 = vsyncadd (%p1243_p7), %s1021_s26, 4294967040  ;;  %s25_s23 = sadd.s32 1, %s1589_s23   ;;  %s2027_s30 = sld [smem:[#allocation19_spill]] }
 0x3f4   : > { %p22_p9 = scmp.ge.s32.totalorder %s25_s23, 4   ;;  %s2028_s20 = sld [smem:[#allocation21_spill]] }
 0x3f5   : > { %s2029_s9 = sld [smem:[#allocation20_spill]]  ;;  %s2030_s18 = smov %s1573_s19 }
 0x3f6   : > { %s2032_s21 = smov %s1585_s22 }
 0x3f7   :  { %24 = sbr.rel (!%p22_p9) target bundleno = 13 (0xd), region = 114 }
 0x3f9   : > { %s2031_s19 = smov %s2027_s30 }
 0x3fb   : > { %s2033_s22 = smov %s2029_s9 }
 0x3fc   :  { %1027 = vsyncpa [#allocation5], 1 }
 0x3fd   :  { %1029 = vsyncpa [#allocation5 + $0x1], 1 }
 0x3fe   :  { %1030 = vsyncpa [#allocation8], 1 }
 0x3ff   :  { %1032 = vsyncpa [#allocation8 + $0x1], 1 }
 0x400   :  { %1033 = vsyncpa [#allocation11], 1 }
 0x401   :  { %1034 = vsyncpa [#allocation6], 1 }
 0x402   :  { %1036 = vsyncpa [#allocation6 + $0x1], 1 }

</bundles_post_ra>
